<compile_context>
chip_gen: v7x
topology: tpu7x:2x2x1
jax: 0.10.0
libtpu: 0.0.40
codegen_flags: <defaults>
</compile_context>

<pallas_src>
import functools

import jax
import jax.numpy as jnp
from jax.experimental import pallas as pl
from jax.experimental.pallas import tpu as pltpu


_VMEM_TILE_BUDGET = 36 * 1024 * 1024   # conservative double-buffered working-set budget (v7x: 64 MiB physical)
_VMEM_LIMIT_BYTES = 48 * 1024 * 1024   # raised scoped limit; > v5e's 16 MiB default, < v7x's 64 MiB physical


def _round_up(x, m):
    return ((x + m - 1) // m) * m


def _vmem_estimate(tm, tn, d, in_isz, out_isz):
    return (2 * tm * d * in_isz        # A tile, double-buffered
            + 2 * d * tn * in_isz      # B (pre-transposed) tile, double-buffered
            + 2 * tm * tn * out_isz    # output tile, double-buffered
            + tm * tn * 4)             # f32 logits temporary before the cast


def _inner_product_decoder_kernel(a_ref, bt_ref, o_ref):
    # a_ref : (tm, D)  row-block i of inp
    # bt_ref: (D, tn)  column-block j of inp.T (pre-transposed in the wrapper)
    # o_ref : (tm, tn) output tile = sigmoid(a @ bt)
    logits = jax.lax.dot_general(
        a_ref[...], bt_ref[...],
        dimension_numbers=(((1,), (0,)), ((), ())),
        preferred_element_type=jnp.float32,
    )
    # sigmoid(x) == 0.5 * tanh(0.5 * x) + 0.5 : single EUP op per vreg, no divide.
    o_ref[...] = (0.5 * jnp.tanh(0.5 * logits) + 0.5).astype(o_ref.dtype)


@functools.partial(
    jax.jit, static_argnames=("tile_m", "tile_n", "out_dtype", "compute_dtype")
)
def inner_product_decoder(inp, *, tile_m=1024, tile_n=2048,
                          out_dtype=None, compute_dtype=None):
    """sigmoid(inp @ inp.T) via a tiled Pallas TPU kernel.

    inp: (N, D) float array.  Dropout p=0.0 -> no-op (module default).
    out_dtype: output dtype (default: inp.dtype).  bf16 halves the dominant
               HBM writeback stream -- recommended for large N.
    compute_dtype: optional cast for the matmul operands (e.g. bf16);
               accumulation remains f32 via preferred_element_type.
    """
    n, d = inp.shape
    out_dtype = out_dtype if out_dtype is not None else inp.dtype
    if compute_dtype is not None:
        inp = inp.astype(compute_dtype)
    in_isz = jnp.dtype(inp.dtype).itemsize
    out_isz = jnp.dtype(out_dtype).itemsize

    # Lane-dense tiles (tm mult of 8, tn mult of 128), clamped to the problem.
    tm = min(tile_m, _round_up(n, 8))
    tn = min(tile_n, _round_up(n, 128))

    # Shrink tiles until the double-buffered working set fits the VMEM budget.
    # This also guards against large D (no K tiling: A/B tile bytes scale with D).
    # TODO(synk): add an 'arbitrary' K grid axis + f32 VMEM accumulator for very
    # wide embeddings (D >~ 4096) instead of shrinking output tiles.
    while _vmem_estimate(tm, tn, d, in_isz, out_isz) > _VMEM_TILE_BUDGET:
        if tm > 256:
            tm = max(8, _round_up(tm // 2, 8))
        elif tn > 512:
            tn = max(128, _round_up(tn // 2, 128))
        elif tm > 8:
            tm = max(8, _round_up(tm // 2, 8))
        else:
            break

    grid_i = pl.cdiv(n, tm)
    grid_j = pl.cdiv(n, tn)
    # v7x shards 'parallel' grid axes over its 2 TensorCores: make sure small /
    # medium problems expose at least 2 blocks so both cores get work.
    if grid_i * grid_j < 2 and n >= 16:
        tm = _round_up(pl.cdiv(n, 2), 8)
        grid_i = pl.cdiv(n, tm)

    # Pre-transposed B operand: (D, N).  Lane-dense B tiles, standard MXU
    # contraction -- no per-tile XLU transpose inside the kernel.  For
    # N <= tile_n there is a single j block, so B stays resident in VMEM.
    bt = inp.T

    cost = pl.CostEstimate(
        flops=2 * n * n * d,
        transcendentals=n * n,
        bytes_accessed=(
            n * d * in_isz                # A: each row block read once
            + grid_i * n * d * in_isz     # B: re-read once per row block
            + n * n * out_isz             # output writeback (dominant stream)
        ),
    )

    return pl.pallas_call(
        _inner_product_decoder_kernel,
        out_shape=jax.ShapeDtypeStruct((n, n), out_dtype),
        grid_spec=pltpu.PrefetchScalarGridSpec(
            num_scalar_prefetch=0,
            grid=(grid_i, grid_j),
            in_specs=[
                # Row-block i of inp; resident across the inner j axis.
                pl.BlockSpec((tm, d), lambda i, j: (i, 0)),
                # Column-block j of inp.T (lane-dense along tn).
                pl.BlockSpec((d, tn), lambda i, j: (0, j)),
            ],
            out_specs=pl.BlockSpec((tm, tn), lambda i, j: (i, j)),
        ),
        compiler_params=pltpu.CompilerParams(
            dimension_semantics=("parallel", "parallel"),
            vmem_limit_bytes=_VMEM_LIMIT_BYTES,
        ),
        cost_estimate=cost,
    )(inp, bt)


def inner_product_decoder_ref(inp):
    # Pure-JAX reference for correctness checking.
    return jax.nn.sigmoid(inp @ inp.T)


if __name__ == "__main__":
    key = jax.random.PRNGKey(0)

    # Small shape consistent with the module: N=8 nodes, hidden=32 latent dims.
    N, D = 8, 32
    inp = jax.random.normal(key, (N, D), dtype=jnp.float32)
    out = jax.block_until_ready(inner_product_decoder(inp))
    ref = inner_product_decoder_ref(inp)
    assert out.shape == (N, N)
    assert jnp.allclose(out, ref, atol=1e-5, rtol=1e-5)

    # Ragged size (not a multiple of 8 / 128): exercises boundary-block masking
    # (no wrapper pad / slice pass) and the >=2-block occupancy split.
    N2, D2 = 200, 64
    inp2 = jax.random.normal(jax.random.PRNGKey(0), (N2, D2), dtype=jnp.float32)
    out2 = jax.block_until_ready(inner_product_decoder(inp2))
    ref2 = inner_product_decoder_ref(inp2)
    assert out2.shape == (N2, N2)
    assert jnp.allclose(out2, ref2, atol=1e-5, rtol=1e-5)

    # Recommended fast path for large N: bf16 output (halves the dominant HBM
    # writeback) + bf16 operands (halves B re-reads).  Smoke test with loose
    # tolerance -- this is an accuracy trade-off the caller opts into.
    out3 = jax.block_until_ready(
        inner_product_decoder(inp2, out_dtype=jnp.bfloat16,
                              compute_dtype=jnp.bfloat16))
    assert out3.shape == (N2, N2)
    assert jnp.allclose(out3.astype(jnp.float32), ref2, atol=1e-1)

    print("KERNEL_OK")
</pallas_src>

<mosaic_0001>
module attributes {stable_mosaic.version = 11 : i64} {
  func.func @_inner_product_decoder_kernel(%arg0: i32, %arg1: i32, %arg2: memref<8x32xf32, #tpu.memory_space<vmem>>, %arg3: memref<32x128xf32, #tpu.memory_space<vmem>>, %arg4: memref<8x128xf32, #tpu.memory_space<vmem>>) attributes {dimension_semantics = [#tpu.dimension_semantics<parallel>, #tpu.dimension_semantics<parallel>], iteration_bounds = array<i64: 1, 1>, scalar_prefetch = 0 : i64, scratch_operands = 0 : i64, tpu.core_type = #tpu.core_type<tc>, window_params = [{transform_indices = @transform_0, window_bounds = array<i64: 8, 32>}, {transform_indices = @transform_1, window_bounds = array<i64: 32, 128>}, {transform_indices = @transform_2, window_bounds = array<i64: 8, 128>}]} {
    %c0 = arith.constant 0 : index
    %c0_0 = arith.constant 0 : index
    %0 = vector.load %arg2[%c0, %c0_0] : memref<8x32xf32, #tpu.memory_space<vmem>>, vector<8x32xf32>
    %c0_1 = arith.constant 0 : index
    %c0_2 = arith.constant 0 : index
    %1 = vector.load %arg3[%c0_1, %c0_2] : memref<32x128xf32, #tpu.memory_space<vmem>>, vector<32x128xf32>
    %cst = arith.constant dense<0.000000e+00> : vector<8x128xf32>
    %2 = tpu.matmul %0, %1, %cst {dimension_numbers = #tpu.dot_dimension_numbers<[1], [0], [0], [1], [0, 0, 1, 1], [], []>} : vector<8x32xf32>, vector<32x128xf32>, vector<8x128xf32> -> vector<8x128xf32>
    %cst_3 = arith.constant 5.000000e-01 : f32
    %3 = vector.broadcast %cst_3 : f32 to vector<8x128xf32>
    %4 = arith.mulf %3, %2 : vector<8x128xf32>
    %5 = math.tanh %4 : vector<8x128xf32>
    %cst_4 = arith.constant 5.000000e-01 : f32
    %6 = vector.broadcast %cst_4 : f32 to vector<8x128xf32>
    %7 = arith.mulf %6, %5 : vector<8x128xf32>
    %cst_5 = arith.constant 5.000000e-01 : f32
    %8 = vector.broadcast %cst_5 : f32 to vector<8x128xf32>
    %9 = arith.addf %7, %8 : vector<8x128xf32>
    %c0_6 = arith.constant 0 : index
    %c0_7 = arith.constant 0 : index
    %10 = vector.load %arg4[%c0_6, %c0_7] : memref<8x128xf32, #tpu.memory_space<vmem>>, vector<8x128xf32>
    tpu.vector_store %arg4[%c0_6, %c0_7], %9 {strides = array<i32>} : memref<8x128xf32, #tpu.memory_space<vmem>>, vector<8x128xf32>,
    return
  }
  func.func @transform_0(%arg0: i32, %arg1: i32) -> (i32, i32) {
    %c0_i32 = arith.constant 0 : i32
    %c0_i32_0 = arith.constant 0 : i32
    return %arg0, %c0_i32 : i32, i32
  }
  func.func @transform_1(%arg0: i32, %arg1: i32) -> (i32, i32) {
    %c0_i32 = arith.constant 0 : i32
    %c0_i32_0 = arith.constant 0 : i32
    return %c0_i32, %arg1 : i32, i32
  }
  func.func @transform_2(%arg0: i32, %arg1: i32) -> (i32, i32) {
    %c0_i32 = arith.constant 0 : i32
    return %arg0, %arg1 : i32, i32
  }
}

</mosaic_0001>

<bundles_post_ra>
// kernel: inner_product_decoder.1
= control target key start
LH: loop header
LB: loop body
LE: loop exit
PB: predicated region body
PF: predicated region fallthrough
CT: control target
= control target key end

     0   :  { %v163_v3 = vmov 0.0|0.0   ;;  %vm164_vm0 = vmmov 0   ;;  %v165_v6 = vmov 0.0   ;;  %s209_s0 = inlined_call_operand.vmem [shape: f32[8,32], index: 0, kind: input, shape index: {}]   ;;  %s210_s1 = inlined_call_operand.vmem [shape: f32[32,8], index: 1, kind: input, shape index: {}]   ;;  %s211_s2 = inlined_call_operand.hbm [shape: f32[8,8], index: 2, kind: output, shape index: {}]  }
   0x1   :  { %v13_v0 = vld [vmem:[%s210_s1] sm:$0xff]  ;;  %v14_v1 = vld [vmem:[%s210_s1 + $0x8] sm:$0xff]  ;;  %v15_v2 = vld [vmem:[%s210_s1 + $0x10] sm:$0xff]  ;;  %127 = vmatprep.subr.bf16.mxu0 %v163_v3  ;;  %124 = vmatprep.mubr.msk.f32.mxu0 %vm164_vm0, %v165_v6 }
   0x2   :  { %v128_v4 = vpack.c.bf16 %v14_v1, %v13_v0  ;;  %v16_v5 = vld [vmem:[%s210_s1 + $0x18] sm:$0xff] }
   0x3   :  { %7 = vsyncpa [#allocation3], 0  ;;  %v131_v7 = vpack.c.bf16 %v16_v5, %v15_v2  ;;  %v12_v8 = vld [vmem:[%s209_s0] sm:$0xff]  ;;  %vm17_vm1 = vcmask 261120   ;;  %s166_s1 = smov [#allocation2]  }
   0x4   :  { %129 = vmatpush3.bf16.msra.mxu0 %v128_v4  ;;  %s102_s19 = sshll.u32 %s166_s1, 4  ;;  %s103_s19 = int_to_ptr.vmem [resolvable:$true] %s102_s19 }
   0x5   :  { %130 = vmatprep.subr.bf16.mxu0 %v163_v3  ;;  %s139_s20 = scalar_lea.vmem %s103_s19, 128  ;;  %p144_p1 = scmp.lt.s32.totalorder %s103_s19, %s103_s19 }
   0x6   :  { %p140_p0 = scmp.ne.s32.totalorder %s103_s19, %s139_s20  ;;  %p145_p2 = scmp.lt.s32.totalorder %s139_s20, %s139_s20 }
   0x8   :  { %132 = vmatpush3.bf16.msra.mxu0 %v131_v7  ;;  %p146_p3 = por %p145_p2, %p144_p1 }
   0xa   :  { %p147_p4 = pnand %p146_p3, %p140_p0 }
   0xb   :  { %125 = vmatmul.mubr.msk.f32.vlgmr.msra.gmra.mrb[0].mxu0 %vm17_vm1, %v12_v8 }
  0xde   :  { %v87_v9 = vpop.f32.mrb[0].mxu0 }
  0xdf   :  { %v91_v10 = vmul.f32 0.5, %v87_v9  ;;  %v126_v11 = vpop.f32.mrb[1].mxu0 }
  0xe1   :  { %137 = vtanh.f32 %v91_v10 }
  0xeb   :  { %v138_v12 = vpop.eup %137 }
  0xec   :  { %v93_v13 = vmul.f32 0.5, %v138_v12 }
  0xee   :  { %v94_v14 = vadd.f32 0.5, %v93_v13 }
  0xf0   :  { %95 = vst [vmem:[#allocation2] sm:$0xff] %v94_v14 }
  0xf1   :  { %150 = shalt.err (!%p147_p4)
}
  0xf2   :  { %s151_s22 = scalar_lea.hbm %s211_s2, 128 }
  0xf3   :  { %p152_p5 = scmp.ne.s32.totalorder %s211_s2, %s151_s22  ;;  %p155_p6 = scmp.lt.u32.totalorder %s151_s22, %s211_s2 }
  0xf5   :  { %p157_p7 = pnand %p155_p6, %p152_p5 }
  0xf7   :  { %160 = shalt.err (!%p157_p7)
}
  0xf8   :  { %105 = dma.vmem_to_hbm [thread:$0]  %s103_s19, 128, %s211_s2, [#allocation3]  }
  0xf9   :  { %161 = dma.done.wait [#allocation3], 128  }
  0xfa   :  { %162 = vsyncadd [#allocation3], 4294967168 }
  0xfb   :  { %109 = vsyncpa [#allocation3], 1 }

</bundles_post_ra>
